<compile_context>
chip_gen: v7x
topology: tpu7x:2x2x1
jax: 0.10.0
libtpu: 0.0.40
codegen_flags: <defaults>
</compile_context>

<pallas_src>
import math

import jax
import jax.numpy as jnp
from jax.experimental import pallas as pl
from jax.experimental.pallas import tpu as pltpu

_LANE = 128


def _build_pe(hidden_size: int, max_len: int = 5000, dtype=jnp.float32):
    """Sinusoidal positional-encoding buffer, shape (1, max_len, hidden)."""
    position = jnp.arange(0, max_len, dtype=jnp.float32)[:, None]            # (max_len, 1)
    div_term = jnp.exp(
        jnp.arange(0, hidden_size, 2, dtype=jnp.float32)
        * (-math.log(10000.0) / hidden_size)
    )                                                                         # (ceil(H/2),)
    angles = position * div_term
    pe = jnp.zeros((max_len, hidden_size), dtype=jnp.float32)
    pe = pe.at[:, 0::2].set(jnp.sin(angles))
    # Guard odd hidden_size: the 1::2 slot has floor(H/2) columns.
    pe = pe.at[:, 1::2].set(jnp.cos(angles)[:, : hidden_size // 2])
    return pe[None].astype(dtype)                                             # (1, max_len, H)


def _pos_enc_kernel(x_ref, pe_ref, o_ref):
    # x_ref/o_ref: (Bt, TL) tiles; pe_ref: (1, TL) -> broadcasts over batch rows.
    # Mixed dtypes promote (e.g. bf16 x + f32 pe adds in f32, like torch);
    # the result is cast to the output (= x) dtype.
    o_ref[...] = (x_ref[...] + pe_ref[...]).astype(o_ref.dtype)


def _vmem_budget():
    """(working-set budget, vmem_limit_bytes) derived from the actual chip."""
    try:
        cap = int(pltpu.get_tpu_info().vmem_capacity_bytes)
    except Exception:
        cap = 64 * 1024 * 1024                       # conservative (v7x per-TC)
    budget = min(48 << 20, (3 * cap) // 8)           # 48 MiB on v5e/v6e, 24 MiB on v7x
    limit = min(budget + (16 << 20), (3 * cap) // 4)  # 64 MiB on v5e/v6e, 40 MiB on v7x
    return budget, limit


def _choose_tiles(B, flat, x_item, pe_item, budget):
    """Pick (Bt, TL) so the double-buffered working set fits `budget`.

    VMEM cost per grid step (default 2-deep pipelining, with sublane padding):
        2*x + 2*out + 2*pe = TL * (4*pad(Bt)*x_item + 2*pad(1)*pe_item)
    """
    x_sub = max(8, 32 // x_item)          # sublane quantum: f32->8, bf16->16, int8->32
    pe_sub = max(8, 32 // pe_item)
    flat_pad = pl.cdiv(flat, _LANE) * _LANE

    def cost_per_lane(bt):
        bt_pad = pl.cdiv(bt, x_sub) * x_sub
        return 4 * bt_pad * x_item + 2 * pe_sub * pe_item

    Bt = B
    TL = (budget // cost_per_lane(B)) // _LANE * _LANE
    if TL < _LANE:
        # Batch so large that a full-batch 128-lane block busts the budget:
        # tile the batch dim too (sublane-aligned), minimum-width lanes.
        TL = _LANE
        Bt = (budget // (_LANE * 4 * x_item)) // x_sub * x_sub
        Bt = max(x_sub, min(Bt, B))
    TL = min(TL, flat_pad)                # no point exceeding the (padded) problem size
    return Bt, TL


def positional_encoding(x: jax.Array, pe: jax.Array, *, budget_bytes=None) -> jax.Array:
    """x: (B, S, H); pe: (1, max_len, H). Returns x + pe[:, :S] (dtype of x)."""
    B, S, H = x.shape
    assert pe.ndim == 3 and pe.shape[0] == 1 and pe.shape[2] == H, "pe must be (1, max_len, H)"
    assert pe.shape[1] >= S, "sequence longer than positional-encoding buffer"

    flat = S * H
    x2d = x.reshape(B, flat)                      # contiguous reshape: free
    pe2d = pe.reshape(1, pe.shape[1] * H)         # full buffer, no per-call slice/cast

    x_item = jnp.dtype(x.dtype).itemsize
    pe_item = jnp.dtype(pe.dtype).itemsize

    budget, vmem_limit = _vmem_budget()
    if budget_bytes is not None:                  # test hook / manual override
        budget = budget_bytes
    Bt, TL = _choose_tiles(B, flat, x_item, pe_item, budget)

    # Batch innermost: the pe block index (0, l) is constant across consecutive
    # steps, so its tile is not re-DMA'd while sweeping the batch.
    grid = (pl.cdiv(flat, TL), pl.cdiv(B, Bt))

    out2d = pl.pallas_call(
        _pos_enc_kernel,
        out_shape=jax.ShapeDtypeStruct((B, flat), x.dtype),
        grid_spec=pltpu.PrefetchScalarGridSpec(
            num_scalar_prefetch=0,
            grid=grid,
            in_specs=[
                pl.BlockSpec((Bt, TL), lambda l, b: (b, l)),    # x
                pl.BlockSpec((1, TL), lambda l, b: (0, l)),     # pe (broadcast over batch)
            ],
            out_specs=pl.BlockSpec((Bt, TL), lambda l, b: (b, l)),
        ),
        compiler_params=pltpu.CompilerParams(
            dimension_semantics=("parallel", "parallel"),
            vmem_limit_bytes=vmem_limit,
        ),
    )(x2d, pe2d)
    return out2d.reshape(B, S, H)


if __name__ == "__main__":
    key = jax.random.PRNGKey(0)
    k1, k2, k3 = jax.random.split(key, 3)
    MAX_LEN = 64  # module default is 5000; small here for a compact test buffer

    # Case 1: lane-aligned shape (H multiple of 128).
    B, S, H = 2, 16, 128
    x = jax.random.normal(k1, (B, S, H), dtype=jnp.float32)
    pe = _build_pe(H, max_len=MAX_LEN, dtype=jnp.float32)
    ref = x + pe[:, :S, :]
    out = jax.block_until_ready(positional_encoding(x, pe))
    assert out.shape == (B, S, H)
    assert jnp.allclose(out, ref, atol=1e-6), "case-1 mismatch vs reference"

    # Case 2: narrow hidden size (H=32) - goes through the same lane-dense flat path.
    B2, S2, H2 = 2, 8, 32
    x2 = jax.random.normal(k2, (B2, S2, H2), dtype=jnp.float32)
    pe2 = _build_pe(H2, max_len=MAX_LEN, dtype=jnp.float32)
    ref2 = x2 + pe2[:, :S2, :]
    out2 = jax.block_until_ready(positional_encoding(x2, pe2))
    assert out2.shape == (B2, S2, H2)
    assert jnp.allclose(out2, ref2, atol=1e-6), "case-2 mismatch vs reference"

    # Case 3: odd S / ragged last lane block; tiny budget forces a multi-tile grid
    # so the cdiv masking path is exercised.
    B3, S3, H3 = 2, 41, 96
    x3 = jax.random.normal(k3, (B3, S3, H3), dtype=jnp.float32)
    pe3 = _build_pe(H3, max_len=MAX_LEN, dtype=jnp.float32)
    ref3 = x3 + pe3[:, :S3, :]
    out3 = jax.block_until_ready(positional_encoding(x3, pe3, budget_bytes=64 * 1024))
    assert out3.shape == (B3, S3, H3)
    assert jnp.allclose(out3, ref3, atol=1e-6), "case-3 mismatch vs reference"

    print("KERNEL_OK")
</pallas_src>

<mosaic_0001>
module attributes {stable_mosaic.version = 11 : i64} {
  func.func @_pos_enc_kernel(%arg0: i32, %arg1: i32, %arg2: memref<2x2048xf32, #tpu.memory_space<vmem>>, %arg3: memref<1x2048xf32, #tpu.memory_space<vmem>>, %arg4: memref<2x2048xf32, #tpu.memory_space<vmem>>) attributes {dimension_semantics = [#tpu.dimension_semantics<parallel>, #tpu.dimension_semantics<parallel>], iteration_bounds = array<i64: 1, 1>, scalar_prefetch = 0 : i64, scratch_operands = 0 : i64, tpu.core_type = #tpu.core_type<tc>, window_params = [{transform_indices = @transform_0, window_bounds = array<i64: 2, 2048>}, {transform_indices = @transform_1, window_bounds = array<i64: 1, 2048>}, {transform_indices = @transform_2, window_bounds = array<i64: 2, 2048>}]} {
    %c0 = arith.constant 0 : index
    %c0_0 = arith.constant 0 : index
    %0 = vector.load %arg2[%c0, %c0_0] : memref<2x2048xf32, #tpu.memory_space<vmem>>, vector<2x2048xf32>
    %c0_1 = arith.constant 0 : index
    %c0_2 = arith.constant 0 : index
    %1 = vector.load %arg3[%c0_1, %c0_2] : memref<1x2048xf32, #tpu.memory_space<vmem>>, vector<1x2048xf32>
    %2 = vector.broadcast %1 : vector<1x2048xf32> to vector<2x2048xf32>
    %3 = arith.addf %0, %2 : vector<2x2048xf32>
    %c0_3 = arith.constant 0 : index
    %c0_4 = arith.constant 0 : index
    %4 = vector.load %arg4[%c0_3, %c0_4] : memref<2x2048xf32, #tpu.memory_space<vmem>>, vector<2x2048xf32>
    tpu.vector_store %arg4[%c0_3, %c0_4], %3 {strides = array<i32>} : memref<2x2048xf32, #tpu.memory_space<vmem>>, vector<2x2048xf32>,
    return
  }
  func.func @transform_0(%arg0: i32, %arg1: i32) -> (i32, i32) {
    %c0_i32 = arith.constant 0 : i32
    return %arg1, %arg0 : i32, i32
  }
  func.func @transform_1(%arg0: i32, %arg1: i32) -> (i32, i32) {
    %c0_i32 = arith.constant 0 : i32
    %c0_i32_0 = arith.constant 0 : i32
    return %c0_i32, %arg0 : i32, i32
  }
  func.func @transform_2(%arg0: i32, %arg1: i32) -> (i32, i32) {
    %c0_i32 = arith.constant 0 : i32
    return %arg1, %arg0 : i32, i32
  }
}

</mosaic_0001>

<bundles_post_ra>
// kernel: tpu_custom_call.1
= control target key start
LH: loop header
LB: loop body
LE: loop exit
PB: predicated region body
PF: predicated region fallthrough
CT: control target
= control target key end

     0   :  { %7 = vsyncpa [#allocation3], 0  ;;  %s345_s0 = inlined_call_operand.hbm [shape: f32[2,2048], index: 0, kind: input, shape index: {}]   ;;  %s346_s1 = inlined_call_operand.hbm [shape: f32[1,8192], index: 1, kind: input, shape index: {}]   ;;  %s347_s2 = inlined_call_operand.hbm [shape: f32[2,2048], index: 2, kind: output, shape index: {}]  }
   0x1   :  { %8 = vsyncpa [#allocation6], 0 }
   0x2   :  { %9 = vsyncpa [#allocation4], 0  ;;  %s280_s9 = smov [#allocation2]   ;;  %s281_s11 = smov [#allocation5]  }
   0x3   :  { %s16_s10 = sshll.u32 %s280_s9, 4  ;;  %s26_s12 = sshll.u32 %s281_s11, 4  ;;  %s17_s10 = int_to_ptr.vmem [resolvable:$true] %s16_s10  ;;  %s299_s12 = int_to_ptr.vmem [resolvable:$true] %s26_s12 }
   0x4   :  { %s208_s15 = scalar_lea.hbm %s345_s0, 512 }
   0x5   :  { %p209_p0 = scmp.ne.s32.totalorder %s345_s0, %s208_s15  ;;  %p212_p1 = scmp.lt.u32.totalorder %s208_s15, %s345_s0 }
   0x7   :  { %p214_p2 = pnand %p212_p1, %p209_p0 }
   0x9   :  { %217 = shalt.err (!%p214_p2)
}
   0xa   :  { %s218_s20 = scalar_lea.vmem %s17_s10, 512  ;;  %p223_p4 = scmp.lt.s32.totalorder %s17_s10, %s17_s10 }
   0xb   :  { %p219_p3 = scmp.ne.s32.totalorder %s17_s10, %s218_s20  ;;  %p224_p5 = scmp.lt.s32.totalorder %s218_s20, %s218_s20 }
   0xd   :  { %p225_p6 = por %p224_p5, %p223_p4 }
   0xf   :  { %p226_p7 = pnand %p225_p6, %p219_p3 }
  0x11   :  { %229 = shalt.err (!%p226_p7)
}
  0x12   :  { %19 = dma.hbm_to_vmem [thread:$0]  %s345_s0, 512, %s17_s10, [#allocation3]  }
  0x13   :  { %s230_s25 = scalar_lea.hbm %s346_s1, 256  ;;  %s232_s30 = scalar_lea.hbm %s346_s1, 1024 }
  0x14   :  { %p231_p8 = scmp.ne.s32.totalorder %s346_s1, %s230_s25  ;;  %p233_p9 = scmp.lt.u32.totalorder %s232_s30, %s230_s25 }
  0x15   :  { %p234_p10 = scmp.lt.u32.totalorder %s230_s25, %s346_s1 }
  0x17   :  { %p235_p11 = por %p234_p10, %p233_p9 }
  0x19   :  { %p236_p12 = pnand %p235_p11, %p231_p8 }
  0x1b   :  { %239 = shalt.err (!%p236_p12)
}
  0x1c   :  { %s240_s0 = scalar_lea.vmem %s299_s12, 256  ;;  %p245_p0 = scmp.lt.s32.totalorder %s299_s12, %s299_s12 }
  0x1d   :  { %p241_p13 = scmp.ne.s32.totalorder %s299_s12, %s240_s0  ;;  %p246_p1 = scmp.lt.s32.totalorder %s240_s0, %s240_s0 }
  0x1f   :  { %p247_p2 = por %p246_p1, %p245_p0 }
  0x21   :  { %p248_p3 = pnand %p247_p2, %p241_p13 }
  0x23   :  { %251 = shalt.err (!%p248_p3)
}
  0x24   :  { %29 = dma.hbm_to_vmem [thread:$0]  %s346_s1, 256, %s299_s12, [#allocation6]  }
  0x25   :  { %274 = dma.done.wait [#allocation3], 512  }
  0x26   :  { %275 = vsyncadd [#allocation3], 4294966784 }
  0x27   :  { %276 = dma.done.wait [#allocation6], 256  }
  0x28   :  { %277 = vsyncadd [#allocation6], 4294967040  ;;  %v44_v0 = vlaneseq  ;;  %v282_v1 = vmov 1983009808   ;;  %v40_v13 = vld [vmem:[#allocation5] sm:$0xff]  ;;  %v41_v19 = vld [vmem:[#allocation5 + $0x8] sm:$0xff] }
  0x29   :  { %v111_v2 = vunpack.c.l.s4 %v282_v1  ;;  %v36_v36 = vld [vmem:[#allocation2] sm:$0xff]  ;;  %v37_v42 = vld [vmem:[#allocation2 + $0x8] sm:$0xff]  ;;  %v38_v50 = vld [vmem:[#allocation2 + $0x10] sm:$0xff]  ;;  %s283_s1 = smov [#allocation7]  }
  0x2a   :  { %v45_v3 = vshrl.u32 %v44_v0, 7  ;;  %v39_v57 = vld [vmem:[#allocation2 + $0x18] sm:$0xff]  ;;  %s194_s7 = sshll.u32 %s283_s1, 4  ;;  %s195_s7 = int_to_ptr.vmem [resolvable:$true] %s194_s7 }
  0x2b   :  { %v112_v4 = vunpack.c.0.s8 %v111_v2  ;;  %s252_s8 = scalar_lea.vmem %s195_s7, 512  ;;  %p257_p5 = scmp.lt.s32.totalorder %s195_s7, %s195_s7 }
  0x2c   :  { %v46_v5 = vsub.s32 0, %v45_v3  ;;  %v50_v6 = vsub.s32 1, %v45_v3  ;;  %v54_v7 = vsub.s32 2, %v45_v3  ;;  %v58_v8 = vsub.s32 3, %v45_v3  ;;  %p253_p4 = scmp.ne.s32.totalorder %s195_s7, %s252_s8  ;;  %p258_p6 = scmp.lt.s32.totalorder %s252_s8, %s252_s8 }
  0x2d   :  { %v62_v9 = vsub.s32 4, %v45_v3  ;;  %v66_v10 = vsub.s32 5, %v45_v3  ;;  %v70_v11 = vsub.s32 6, %v45_v3  ;;  %v74_v12 = vsub.s32 7, %v45_v3 }
  0x2e   :  { %v115_v14 = vsub.s32 %v112_v4, %v45_v3  ;;  %v47_v15 = vrot.slane %v40_v13, %v46_v5  ;;  %v51_v16 = vrot.slane %v40_v13, %v50_v6  ;;  %v55_v17 = vrot.slane %v40_v13, %v54_v7  ;;  %p259_p7 = por %p258_p6, %p257_p5 }
  0x2f   :  { %v59_v18 = vrot.slane %v40_v13, %v58_v8  ;;  %v63_v20 = vrot.slane %v40_v13, %v62_v9  ;;  %v67_v21 = vrot.slane %v40_v13, %v66_v10  ;;  %v71_v22 = vrot.slane %v40_v13, %v70_v11 }
  0x30   :  { %v75_v23 = vrot.slane %v40_v13, %v74_v12  ;;  %v108_v24 = vcombine.low %v47_v15, %v51_v16  ;;  %v79_v26 = vrot.slane %v41_v19, %v46_v5  ;;  %v83_v27 = vrot.slane %v41_v19, %v50_v6  ;;  %p260_p8 = pnand %p259_p7, %p253_p4 }
  0x31   :  { %v109_v25 = vcombine.low %v55_v17, %v59_v18  ;;  %v125_v28 = vcombine.low %v63_v20, %v67_v21  ;;  %v87_v30 = vrot.slane %v41_v19, %v54_v7  ;;  %v91_v31 = vrot.slane %v41_v19, %v58_v8 }
  0x32   :  { %v126_v29 = vcombine.low %v71_v22, %v75_v23  ;;  %v116_v32 = vrot.slane %v108_v24, %v115_v14  ;;  %v142_v34 = vcombine.low %v79_v26, %v83_v27  ;;  %v95_v35 = vrot.slane %v41_v19, %v62_v9 }
  0x33   :  { %v123_v33 = vrot.slane %v109_v25, %v115_v14  ;;  %v133_v37 = vrot.slane %v125_v28, %v115_v14  ;;  %v143_v39 = vcombine.low %v87_v30, %v91_v31  ;;  %v99_v40 = vrot.slane %v41_v19, %v66_v10 }
  0x34   :  { %v140_v38 = vrot.slane %v126_v29, %v115_v14  ;;  %v150_v43 = vrot.slane %v142_v34, %v115_v14  ;;  %v103_v44 = vrot.slane %v41_v19, %v70_v11  ;;  %v107_v45 = vrot.slane %v41_v19, %v74_v12 }
  0x35   :  { %v124_v41 = vcombine.low %v116_v32, %v123_v33  ;;  %v157_v47 = vrot.slane %v143_v39, %v115_v14  ;;  %v159_v48 = vcombine.low %v95_v35, %v99_v40 }
  0x36   :  { %v141_v46 = vcombine.low %v133_v37, %v140_v38  ;;  %v160_v51 = vcombine.low %v103_v44, %v107_v45 }
  0x37   :  { %v180_v49 = vadd.f32 %v124_v41, %v36_v36  ;;  %v158_v53 = vcombine.low %v150_v43, %v157_v47  ;;  %v167_v54 = vrot.slane %v159_v48, %v115_v14 }
  0x38   :  { %v181_v52 = vadd.f32 %v141_v46, %v37_v42  ;;  %v174_v55 = vrot.slane %v160_v51, %v115_v14 }
  0x39   :  { %184 = vst [vmem:[#allocation7] sm:$0xff] %v180_v49  ;;  %v182_v56 = vadd.f32 %v158_v53, %v38_v50 }
  0x3a   :  { %185 = vst [vmem:[#allocation7 + $0x8] sm:$0xff] %v181_v52  ;;  %v175_v58 = vcombine.low %v167_v54, %v174_v55 }
  0x3b   :  { %186 = vst [vmem:[#allocation7 + $0x10] sm:$0xff] %v182_v56 }
  0x3c   :  { %v183_v59 = vadd.f32 %v175_v58, %v39_v57 }
  0x3e   :  { %187 = vst [vmem:[#allocation7 + $0x18] sm:$0xff] %v183_v59 }
  0x3f   :  { %263 = shalt.err (!%p260_p8)
}
  0x40   :  { %s264_s11 = scalar_lea.hbm %s347_s2, 512 }
  0x41   :  { %p265_p9 = scmp.ne.s32.totalorder %s347_s2, %s264_s11  ;;  %p268_p10 = scmp.lt.u32.totalorder %s264_s11, %s347_s2 }
  0x43   :  { %p270_p11 = pnand %p268_p10, %p265_p9 }
  0x45   :  { %273 = shalt.err (!%p270_p11)
}
  0x46   :  { %197 = dma.vmem_to_hbm [thread:$0]  %s195_s7, 512, %s347_s2, [#allocation4]  }
  0x47   :  { %278 = dma.done.wait [#allocation4], 512  }
  0x48   :  { %279 = vsyncadd [#allocation4], 4294966784 }
  0x49   :  { %201 = vsyncpa [#allocation3], 1 }
  0x4a   :  { %202 = vsyncpa [#allocation6], 1 }
  0x4b   :  { %203 = vsyncpa [#allocation4], 1 }

</bundles_post_ra>
